<compile_context>
chip_gen: v6e
topology: v6e:2x2x1
jax: 0.10.0
libtpu: 0.0.40
codegen_flags: <defaults>
</compile_context>

<pallas_src>
import functools

import jax
import jax.numpy as jnp
from jax.experimental import pallas as pl
from jax.experimental.pallas import tpu as pltpu


def _round_up(v, m):
    return (v + m - 1) // m * m


def _make_kernel(rows, row_tile, lane, tiles_per_core, num_tiles, needs_mask):
    """Builds the reduction kernel for the given (static) tiling."""
    if row_tile % 8 == 0:
        fold_rows = 8

        def fold(v):  # (row_tile, lane) -> (8, lane): pure VPU adds, no XLU
            return jnp.sum(v.reshape(row_tile // 8, 8, lane), axis=0)
    else:
        # Tiny-input case (rows < 8, single tile): no per-step fold needed.
        fold_rows = row_tile

        def fold(v):
            return v

    def kernel(x_ref, y_ref, o_ref):
        j = pl.program_id(1)

        @pl.when(j == 0)
        def _():
            o_ref[...] = jnp.zeros_like(o_ref)

        x = x_ref[...]
        y = y_ref[...]

        pos = y == 1.0
        neg = y == 0.0

        if needs_mask:
            # Mask rows beyond the real extent (ragged last tile and/or the
            # duplicated clamped tiles when num_tiles % num_cores != 0).
            i = pl.program_id(0)
            t = i * tiles_per_core + j
            rid = t * row_tile + jax.lax.broadcasted_iota(
                jnp.int32, (row_tile, lane), 0)
            valid = rid < rows
            pos = jnp.logical_and(pos, valid)
            neg = jnp.logical_and(neg, valid)

        one = jnp.float32(1.0)
        zero = jnp.float32(0.0)

        # Single log per element: z = x where label==1 else (1 - x).
        # torch.nn.functional.binary_cross_entropy clamps log terms at -100.
        z = jnp.where(pos, x, one - x)
        nlogz = -jnp.maximum(jnp.log(z), jnp.float32(-100.0))

        # All contributions are where-selected (not mask-multiplied) so any
        # garbage in masked-out rows can never poison the sums with NaN/Inf.
        o_ref[0, 0] += fold(jnp.where(pos, one, zero))    # count_pos
        o_ref[0, 1] += fold(jnp.where(neg, one, zero))    # count_neg
        o_ref[0, 2] += fold(jnp.where(pos, nlogz, zero))  # sum -log(x)   @ label==1
        o_ref[0, 3] += fold(jnp.where(neg, nlogz, zero))  # sum -log(1-x) @ label==0

    return kernel, fold_rows


@functools.partial(jax.jit, static_argnames=("lane", "target_rows", "num_cores"))
def weighed_bce_loss(x, label, *, lane=512, target_rows=512, num_cores=2):
    """x, label: same-shaped float arrays; x in (0,1), label in {0,1}."""
    assert x.shape == label.shape
    assert lane % 128 == 0
    total = x.size
    target_rows = _round_up(target_rows, 8)

    # Flatten (free for contiguous arrays) and lay out lane-dense.
    xf = x.reshape(-1).astype(jnp.float32)
    yf = label.reshape(-1).astype(jnp.float32)

    L = lane if total >= lane else _round_up(total, 128)
    padded_total = _round_up(total, L)
    if padded_total != total:
        # Tiny 1-D tail pad (< L elements). x=0.5 keeps the log finite,
        # label=-1 hits neither mask so the pad contributes nothing.
        pad = padded_total - total
        xf = jnp.pad(xf, (0, pad), constant_values=0.5)
        yf = jnp.pad(yf, (0, pad), constant_values=-1.0)

    rows = padded_total // L
    x2 = xf.reshape(rows, L)
    y2 = yf.reshape(rows, L)

    if rows >= 8:
        row_tile = min(target_rows, (rows // 8) * 8)   # multiple of 8, <= rows
    else:
        row_tile = rows                                # single tiny tile

    num_tiles = pl.cdiv(rows, row_tile)
    tiles_per_core = pl.cdiv(num_tiles, num_cores)
    needs_mask = (rows % row_tile != 0) or (num_tiles % num_cores != 0)

    kernel, fold_rows = _make_kernel(rows, row_tile, L, tiles_per_core,
                                     num_tiles, needs_mask)

    def in_map(i, j):
        # Clamp so the DMA never walks past the last (possibly ragged) tile;
        # the in-kernel row mask zeroes any duplicated/overhanging work.
        return (jnp.minimum(i * tiles_per_core + j, num_tiles - 1), 0)

    partials = pl.pallas_call(
        kernel,
        out_shape=jax.ShapeDtypeStruct((num_cores, 4, fold_rows, L),
                                       jnp.float32),
        grid_spec=pltpu.PrefetchScalarGridSpec(
            num_scalar_prefetch=0,
            grid=(num_cores, tiles_per_core),
            in_specs=[
                pl.BlockSpec((row_tile, L), in_map),
                pl.BlockSpec((row_tile, L), in_map),
            ],
            out_specs=pl.BlockSpec((1, 4, fold_rows, L),
                                   lambda i, j: (i, 0, 0, 0)),
        ),
        compiler_params=pltpu.CompilerParams(
            dimension_semantics=("parallel", "arbitrary"),
            vmem_limit_bytes=32 * 1024 * 1024,
        ),
    )(x2, y2)

    sums = jnp.sum(partials, axis=(0, 2, 3))  # (4,) final tiny reduce in XLA
    count_pos, count_neg = sums[0], sums[1]
    sum_bce_pos, sum_bce_neg = sums[2], sums[3]
    p = count_pos / (count_pos + count_neg)
    loss = (p * sum_bce_pos + (1.0 - p) * sum_bce_neg) / jnp.float32(total)
    return loss


def _reference_loss(x, label):
    """Pure-JAX reference mirroring the PyTorch module (for sanity checking)."""
    label = label.astype(jnp.float32)
    x = x.astype(jnp.float32)
    label_t = (label == 1).astype(jnp.float32)
    label_f = (label == 0).astype(jnp.float32)
    p = jnp.sum(label_t) / (jnp.sum(label_t) + jnp.sum(label_f))
    w = label_t * p + label_f * (1.0 - p)
    log_x = jnp.maximum(jnp.log(x), -100.0)
    log_1mx = jnp.maximum(jnp.log(1.0 - x), -100.0)
    bce = -(label * log_x + (1.0 - label) * log_1mx)
    return jnp.mean(w * bce)


if __name__ == "__main__":
    key = jax.random.PRNGKey(0)
    kx, kl, kx2, kl2 = jax.random.split(key, 4)

    # Shapes implied by the module's forward: (batch, H, W).
    N, H, W = 2, 16, 16
    x = jax.nn.sigmoid(jax.random.normal(kx, (N, H, W), dtype=jnp.float32))
    label = (jax.random.uniform(kl, (N, H, W)) > 0.5).astype(jnp.float32)

    loss = jax.block_until_ready(weighed_bce_loss(x, label))
    ref = _reference_loss(x, label)
    assert jnp.allclose(loss, ref, rtol=1e-5, atol=1e-6), (loss, ref)

    # Second shape: exercises the lane-tail pad, a ragged row tile, and both
    # per-core accumulator rows (small tiles forced via target_rows).
    N2, H2, W2 = 2, 40, 60
    x2 = jax.nn.sigmoid(jax.random.normal(kx2, (N2, H2, W2), dtype=jnp.float32))
    label2 = (jax.random.uniform(kl2, (N2, H2, W2)) > 0.3).astype(jnp.float32)
    loss2 = jax.block_until_ready(weighed_bce_loss(x2, label2, target_rows=8))
    ref2 = _reference_loss(x2, label2)
    assert jnp.allclose(loss2, ref2, rtol=1e-5, atol=1e-6), (loss2, ref2)

    print("KERNEL_OK")
</pallas_src>

<mosaic_0001>
module attributes {stable_mosaic.version = 11 : i64} {
  func.func @kernel(%arg0: i32, %arg1: i32, %arg2: memref<1x512xf32, #tpu.memory_space<vmem>>, %arg3: memref<1x512xf32, #tpu.memory_space<vmem>>, %arg4: memref<1x4x1x512xf32, #tpu.memory_space<vmem>>) attributes {dimension_semantics = [#tpu.dimension_semantics<parallel>, #tpu.dimension_semantics<arbitrary>], iteration_bounds = array<i64: 2, 1>, scalar_prefetch = 0 : i64, scratch_operands = 0 : i64, tpu.core_type = #tpu.core_type<tc>, window_params = [{transform_indices = @transform_0, window_bounds = array<i64: 1, 512>}, {transform_indices = @transform_1, window_bounds = array<i64: 1, 512>}, {transform_indices = @transform_2, window_bounds = array<i64: 1, 4, 1, 512>}]} {
    %c0_i32 = arith.constant 0 : i32
    %0 = arith.cmpi eq, %arg1, %c0_i32 : i32
    %1 = arith.extui %0 : i1 to i32
    %c0_i32_0 = arith.constant 0 : i32
    %2 = arith.cmpi ne, %1, %c0_i32_0 : i32
    scf.if %2 {
      %cst_45 = arith.constant 0.000000e+00 : f32
      %61 = vector.broadcast %cst_45 : f32 to vector<1x4x1x512xf32>
      %c0_46 = arith.constant 0 : index
      %c0_47 = arith.constant 0 : index
      %c0_48 = arith.constant 0 : index
      %c0_49 = arith.constant 0 : index
      %62 = vector.load %arg4[%c0_46, %c0_47, %c0_48, %c0_49] : memref<1x4x1x512xf32, #tpu.memory_space<vmem>>, vector<1x4x1x512xf32>
      tpu.vector_store %arg4[%c0_46, %c0_47, %c0_48, %c0_49], %61 {strides = array<i32>} : memref<1x4x1x512xf32, #tpu.memory_space<vmem>>, vector<1x4x1x512xf32>,
    } else {
    }
    %c0 = arith.constant 0 : index
    %c0_1 = arith.constant 0 : index
    %3 = vector.load %arg2[%c0, %c0_1] : memref<1x512xf32, #tpu.memory_space<vmem>>, vector<1x512xf32>
    %c0_2 = arith.constant 0 : index
    %c0_3 = arith.constant 0 : index
    %4 = vector.load %arg3[%c0_2, %c0_3] : memref<1x512xf32, #tpu.memory_space<vmem>>, vector<1x512xf32>
    %cst = arith.constant 1.000000e+00 : f32
    %5 = vector.broadcast %cst : f32 to vector<1x512xf32>
    %6 = arith.cmpf oeq, %4, %5 : vector<1x512xf32>
    %cst_4 = arith.constant 0.000000e+00 : f32
    %7 = vector.broadcast %cst_4 : f32 to vector<1x512xf32>
    %8 = arith.cmpf oeq, %4, %7 : vector<1x512xf32>
    %c1_i32 = arith.constant 1 : i32
    %9 = arith.muli %arg0, %c1_i32 : i32
    %10 = arith.addi %9, %arg1 : i32
    %c1_i32_5 = arith.constant 1 : i32
    %11 = arith.muli %10, %c1_i32_5 : i32
    %12 = tpu.iota {dimensions = array<i32: 0>} : vector<1x512xi32>
    %13 = vector.broadcast %11 : i32 to vector<1x512xi32>
    %14 = arith.addi %13, %12 : vector<1x512xi32>
    %c1_i32_6 = arith.constant 1 : i32
    %15 = vector.broadcast %c1_i32_6 : i32 to vector<1x512xi32>
    %16 = arith.cmpi slt, %14, %15 : vector<1x512xi32>
    %17 = arith.andi %6, %16 : vector<1x512xi1>
    %18 = arith.andi %8, %16 : vector<1x512xi1>
    %cst_7 = arith.constant 1.000000e+00 : f32
    %19 = vector.broadcast %cst_7 : f32 to vector<1x512xf32>
    %20 = arith.subf %19, %3 : vector<1x512xf32>
    %21 = arith.select %17, %3, %20 : vector<1x512xi1>, vector<1x512xf32>
    %22 = math.log %21 : vector<1x512xf32>
    %cst_8 = arith.constant -1.000000e+02 : f32
    %23 = vector.broadcast %cst_8 : f32 to vector<1x512xf32>
    %24 = arith.maximumf %22, %23 : vector<1x512xf32>
    %cst_9 = arith.constant 0.000000e+00 : f32
    %25 = vector.broadcast %cst_9 : f32 to vector<1x512xf32>
    %26 = arith.subf %25, %24 : vector<1x512xf32>
    %c0_10 = arith.constant 0 : index
    %c0_11 = arith.constant 0 : index
    %c0_12 = arith.constant 0 : index
    %c0_13 = arith.constant 0 : index
    %27 = vector.load %arg4[%c0_10, %c0_11, %c0_12, %c0_13] : memref<1x4x1x512xf32, #tpu.memory_space<vmem>>, vector<1x1x1x512xf32>
    %28 = vector.shape_cast %27 : vector<1x1x1x512xf32> to vector<1x512xf32>
    %cst_14 = arith.constant 1.000000e+00 : f32
    %cst_15 = arith.constant 0.000000e+00 : f32
    %29 = vector.broadcast %cst_14 : f32 to vector<1x512xf32>
    %30 = vector.broadcast %cst_15 : f32 to vector<1x512xf32>
    %31 = arith.select %17, %29, %30 : vector<1x512xi1>, vector<1x512xf32>
    %32 = arith.addf %28, %31 : vector<1x512xf32>
    %c0_16 = arith.constant 0 : index
    %c0_17 = arith.constant 0 : index
    %c0_18 = arith.constant 0 : index
    %c0_19 = arith.constant 0 : index
    %33 = vector.load %arg4[%c0_16, %c0_17, %c0_18, %c0_19] : memref<1x4x1x512xf32, #tpu.memory_space<vmem>>, vector<1x1x1x512xf32>
    %34 = vector.shape_cast %33 : vector<1x1x1x512xf32> to vector<1x512xf32>
    %35 = vector.shape_cast %32 : vector<1x512xf32> to vector<1x1x1x512xf32>
    tpu.vector_store %arg4[%c0_16, %c0_17, %c0_18, %c0_19], %35 {strides = array<i32>} : memref<1x4x1x512xf32, #tpu.memory_space<vmem>>, vector<1x1x1x512xf32>,
    %c0_20 = arith.constant 0 : index
    %c1 = arith.constant 1 : index
    %c0_21 = arith.constant 0 : index
    %c0_22 = arith.constant 0 : index
    %36 = vector.load %arg4[%c0_20, %c1, %c0_21, %c0_22] : memref<1x4x1x512xf32, #tpu.memory_space<vmem>>, vector<1x1x1x512xf32>
    %37 = vector.shape_cast %36 : vector<1x1x1x512xf32> to vector<1x512xf32>
    %cst_23 = arith.constant 1.000000e+00 : f32
    %cst_24 = arith.constant 0.000000e+00 : f32
    %38 = vector.broadcast %cst_23 : f32 to vector<1x512xf32>
    %39 = vector.broadcast %cst_24 : f32 to vector<1x512xf32>
    %40 = arith.select %18, %38, %39 : vector<1x512xi1>, vector<1x512xf32>
    %41 = arith.addf %37, %40 : vector<1x512xf32>
    %c0_25 = arith.constant 0 : index
    %c1_26 = arith.constant 1 : index
    %c0_27 = arith.constant 0 : index
    %c0_28 = arith.constant 0 : index
    %42 = vector.load %arg4[%c0_25, %c1_26, %c0_27, %c0_28] : memref<1x4x1x512xf32, #tpu.memory_space<vmem>>, vector<1x1x1x512xf32>
    %43 = vector.shape_cast %42 : vector<1x1x1x512xf32> to vector<1x512xf32>
    %44 = vector.shape_cast %41 : vector<1x512xf32> to vector<1x1x1x512xf32>
    tpu.vector_store %arg4[%c0_25, %c1_26, %c0_27, %c0_28], %44 {strides = array<i32>} : memref<1x4x1x512xf32, #tpu.memory_space<vmem>>, vector<1x1x1x512xf32>,
    %c0_29 = arith.constant 0 : index
    %c2 = arith.constant 2 : index
    %c0_30 = arith.constant 0 : index
    %c0_31 = arith.constant 0 : index
    %45 = vector.load %arg4[%c0_29, %c2, %c0_30, %c0_31] : memref<1x4x1x512xf32, #tpu.memory_space<vmem>>, vector<1x1x1x512xf32>
    %46 = vector.shape_cast %45 : vector<1x1x1x512xf32> to vector<1x512xf32>
    %cst_32 = arith.constant 0.000000e+00 : f32
    %47 = vector.broadcast %cst_32 : f32 to vector<1x512xf32>
    %48 = arith.select %17, %26, %47 : vector<1x512xi1>, vector<1x512xf32>
    %49 = arith.addf %46, %48 : vector<1x512xf32>
    %c0_33 = arith.constant 0 : index
    %c2_34 = arith.constant 2 : index
    %c0_35 = arith.constant 0 : index
    %c0_36 = arith.constant 0 : index
    %50 = vector.load %arg4[%c0_33, %c2_34, %c0_35, %c0_36] : memref<1x4x1x512xf32, #tpu.memory_space<vmem>>, vector<1x1x1x512xf32>
    %51 = vector.shape_cast %50 : vector<1x1x1x512xf32> to vector<1x512xf32>
    %52 = vector.shape_cast %49 : vector<1x512xf32> to vector<1x1x1x512xf32>
    tpu.vector_store %arg4[%c0_33, %c2_34, %c0_35, %c0_36], %52 {strides = array<i32>} : memref<1x4x1x512xf32, #tpu.memory_space<vmem>>, vector<1x1x1x512xf32>,
    %c0_37 = arith.constant 0 : index
    %c3 = arith.constant 3 : index
    %c0_38 = arith.constant 0 : index
    %c0_39 = arith.constant 0 : index
    %53 = vector.load %arg4[%c0_37, %c3, %c0_38, %c0_39] : memref<1x4x1x512xf32, #tpu.memory_space<vmem>>, vector<1x1x1x512xf32>
    %54 = vector.shape_cast %53 : vector<1x1x1x512xf32> to vector<1x512xf32>
    %cst_40 = arith.constant 0.000000e+00 : f32
    %55 = vector.broadcast %cst_40 : f32 to vector<1x512xf32>
    %56 = arith.select %18, %26, %55 : vector<1x512xi1>, vector<1x512xf32>
    %57 = arith.addf %54, %56 : vector<1x512xf32>
    %c0_41 = arith.constant 0 : index
    %c3_42 = arith.constant 3 : index
    %c0_43 = arith.constant 0 : index
    %c0_44 = arith.constant 0 : index
    %58 = vector.load %arg4[%c0_41, %c3_42, %c0_43, %c0_44] : memref<1x4x1x512xf32, #tpu.memory_space<vmem>>, vector<1x1x1x512xf32>
    %59 = vector.shape_cast %58 : vector<1x1x1x512xf32> to vector<1x512xf32>
    %60 = vector.shape_cast %57 : vector<1x512xf32> to vector<1x1x1x512xf32>
    tpu.vector_store %arg4[%c0_41, %c3_42, %c0_43, %c0_44], %60 {strides = array<i32>} : memref<1x4x1x512xf32, #tpu.memory_space<vmem>>, vector<1x1x1x512xf32>,
    return
  }
  func.func @transform_0(%arg0: i32, %arg1: i32) -> (i32, i32) {
    %c1_i32 = arith.constant 1 : i32
    %0 = arith.muli %arg0, %c1_i32 : i32
    %1 = arith.addi %0, %arg1 : i32
    %c0_i32 = arith.constant 0 : i32
    %2 = arith.minsi %1, %c0_i32 : i32
    %c0_i32_0 = arith.constant 0 : i32
    %c0_i32_1 = arith.constant 0 : i32
    return %2, %c0_i32_0 : i32, i32
  }
  func.func @transform_1(%arg0: i32, %arg1: i32) -> (i32, i32) {
    %c1_i32 = arith.constant 1 : i32
    %0 = arith.muli %arg0, %c1_i32 : i32
    %1 = arith.addi %0, %arg1 : i32
    %c0_i32 = arith.constant 0 : i32
    %2 = arith.minsi %1, %c0_i32 : i32
    %c0_i32_0 = arith.constant 0 : i32
    %c0_i32_1 = arith.constant 0 : i32
    return %2, %c0_i32_0 : i32, i32
  }
  func.func @transform_2(%arg0: i32, %arg1: i32) -> (i32, i32, i32, i32) {
    %c0_i32 = arith.constant 0 : i32
    %c0_i32_0 = arith.constant 0 : i32
    %c0_i32_1 = arith.constant 0 : i32
    %c0_i32_2 = arith.constant 0 : i32
    return %arg0, %c0_i32, %c0_i32_0, %c0_i32_1 : i32, i32, i32, i32
  }
}

</mosaic_0001>

<bundles_post_ra>
// kernel: weighed_bce_loss.1
= control target key start
LH: loop header
LB: loop body
LE: loop exit
PB: predicated region body
PF: predicated region fallthrough
CT: control target
= control target key end

     0   :  { %s433_s9 = smov 0   ;;  %s435_s10 = smov 0   ;;  %s523_s0 = inlined_call_operand.vmem [shape: f32[1,512], index: 0, kind: input, shape index: {}]   ;;  %s524_s1 = inlined_call_operand.vmem [shape: f32[1,512], index: 1, kind: input, shape index: {}]   ;;  %s525_s2 = inlined_call_operand.vmem [shape: f32[2,4,1,512], index: 2, kind: output, shape index: {}]  }
   0x1   :  { %s437_s11 = smov 0  }
   0x2 LB: > { %s24_s12 = sadd.s32 1, %s410_s10  ;;  %p346_p0 = scmp.ge.s32.totalorder %s414_s11, 1  ;;  %s414_s11 = sphi %s437_s11, %s12_s11   ;;  %s410_s10 = sphi %s435_s10, %s533_s10   ;;  %s406_s9 = sphi %s433_s9, %s532_s9  }
   0x3   : > { %p26_p1 = scmp.ge.s32.totalorder %s24_s12, 2  ;;  %p156_p2 = scmp.lt.s32.totalorder %s414_s11, 3 }
   0x5   : > { %s535_s12 = smov (%p26_p1, %s24_s12), 0  ;;  %p157_p3 = pnand %p346_p0, %p156_p2 }
   0x6   : > { %p206_p4 = scmp.lt.s32.totalorder (!%p157_p3), %s406_s9, 1  ;;  %p187_p5 = scmp.lt.s32.totalorder (!%p157_p3), %s406_s9, 0 }
   0x7   : > { %160 = sbr.rel (%p157_p3) target bundleno = 49 (0x31), region = 28 }
   0xc   : > { %v214_v0 = vlaneseq  ;;  %v229_v1 = vstv %s406_s9  ;;  %s207_s13 = scalar_select %p206_p4, %s406_s9, 1  ;;  %v416_v6 = vmov 0.0   ;;  %v417_v7 = vmov 0  }
   0xd   : > { %s188_s14 = scalar_select %p187_p5, %s406_s9, 0 }
   0xe   : > { %v228_v2 = vshrl.u32 %v214_v0, 7  ;;  %vm451_vm0 = vcmp.lt.s32.totalorder %v214_v0, 512  ;;  %s355_s15 = sshll.u32 %s207_s13, 4 }
   0xf   : > { %s459_s18 = scalar_lea.vmem %s525_s2, %s355_s15  ;;  %s537_s14 = smov (!%p187_p5, %s188_s14), 0 }
  0x10   : > { %v230_v4 = vadd.s32 %v229_v1, %v228_v2  ;;  %v235_v5 = vsub.s32 0, %v228_v2  ;;  %218 = vst.msk [vmem:[%s459_s18] sm:$0xf] %vm451_vm0, %v416_v6  ;;  %219 = vst.msk [vmem:[%s459_s18 + $0x4] sm:$0xf] %vm451_vm0, %v416_v6  ;;  %s350_s19 = sshll.u32 %s537_s14, 2 }
  0x11   : > { %220 = vst.msk [vmem:[%s459_s18 + $0x8] sm:$0xf] %vm451_vm0, %v416_v6  ;;  %221 = vst.msk [vmem:[%s459_s18 + $0xc] sm:$0xf] %vm451_vm0, %v416_v6  ;;  %s192_s22 = scalar_lea.vmem %s523_s0, %s350_s19  ;;  %s202_s25 = scalar_lea.vmem %s524_s1, %s350_s19 }
  0x12   : > { %vm231_vm1 = vcmp.lt.s32.totalorder %v230_v4, 1  ;;  %v222_v10 = vld [vmem:[%s192_s22] sm:$0xf] }
  0x13   : > { %v232_v8 = vsel %vm231_vm1, 1, %v417_v7  ;;  %v223_v11 = vld [vmem:[%s202_s25] sm:$0xf]  ;;  %v240_v12 = vsub.f32 1.0, %v222_v10 }
  0x14   : > { %v236_v9 = vrot.slane %v232_v8, %v235_v5  ;;  %vm224_vm3 = vcmp.eq.f32.partialorder %v223_v11, 1.0  ;;  %vm225_vm4 = vcmp.eq.f32.partialorder %v223_v11, 0.0 }
  0x16   : > { %vm237_vm2 = vcmp.ne.s32.totalorder %v236_v9, 0 }
  0x17   : > { %vm480_vm5 = vmand %vm224_vm3, %vm237_vm2  ;;  %v246_v15 = vld [vmem:[%s459_s18] sm:$0xf]  ;;  %v356_v18 = vld [vmem:[%s459_s18 + $0x4] sm:$0xf] }
  0x18   : > { %v241_v14 = vsel %vm480_vm5, %v222_v10, %v240_v12  ;;  %v247_v16 = vsel %vm480_vm5, 1.0, %v416_v6  ;;  %vm489_vm6 = vmand %vm225_vm4, %vm237_vm2  ;;  %v358_v26 = vld [vmem:[%s459_s18 + $0x8] sm:$0xf]  ;;  %v360_v27 = vld [vmem:[%s459_s18 + $0xc] sm:$0xf] }
  0x19   : > { %390 = vlog2.f32 %v241_v14  ;;  %v248_v19 = vadd.f32 %v247_v16, %v246_v15  ;;  %v256_v20 = vsel %vm489_vm6, 1.0, %v416_v6 }
  0x1a   : > { %v257_v21 = vadd.f32 %v356_v18, %v256_v20 }
  0x1b   : > { %253 = vst.msk [vmem:[%s459_s18] sm:$0xf] %vm451_vm0, %v248_v19 }
  0x1c   : > { %357 = vst.msk [vmem:[%s459_s18 + $0x4] sm:$0xf] %vm451_vm0, %v257_v21 }
  0x26   : > { %v391_v22 = vpop.eup %390 }
  0x27   : > { %v243_v23 = vmul.f32 0.6931472, %v391_v22 }
  0x29   : > { %v244_v24 = vmax.f32 %v243_v23, -100.0 }
  0x2b   : > { %v245_v25 = vsub.f32 0.0, %v244_v24 }
  0x2d   : > { %v261_v28 = vsel %vm480_vm5, %v245_v25, 0.0  ;;  %v266_v29 = vsel %vm489_vm6, %v245_v25, 0.0 }
  0x2e   : > { %v262_v30 = vadd.f32 %v358_v26, %v261_v28  ;;  %v267_v31 = vadd.f32 %v360_v27, %v266_v29 }
  0x30   : > { %359 = vst.msk [vmem:[%s459_s18 + $0x8] sm:$0xf] %vm451_vm0, %v262_v30  ;;  %361 = vst.msk [vmem:[%s459_s18 + $0xc] sm:$0xf] %vm451_vm0, %v267_v31 }
  0x31 PF: > { %s12_s11 = sadd.s32 1, %s414_s11   ;;  %s532_s9 = smov %s410_s10 }
  0x32   : > { %p9_p6 = scmp.ge.s32.totalorder %s12_s11, 4   ;;  %s533_s10 = smov %s535_s12 }
  0x34   :  { %11 = sbr.rel (!%p9_p6) target bundleno = 2 (0x2), region = 68 }

</bundles_post_ra>
